<compile_context>
chip_gen: v5e
topology: v5e:2x2
jax: 0.10.0
libtpu: 0.0.40
codegen_flags: <defaults>
</compile_context>

<pallas_src>
import math
import functools

import jax
import jax.numpy as jnp
from jax.experimental import pallas as pl
from jax.experimental.pallas import tpu as pltpu

SMALL = 1e-16
SLAB = 128  # lane-dense packed-output width


def _round_up(n, m):
    return ((n + m - 1) // m) * m


def _mf_ibp_vae_kernel(x_ref, noise_ref, wt_ref, b_ref, a_ref, out_ref,
                       *, K, D, sigma_n, temperature):
    """One batch tile: encoder -> ST relaxed-Bernoulli sample -> decode -> NLL.

    Output slab layout (lane index):
      [0:K)            q_z probs
      [K:2K)           z sample (hard, straight-through forward value)
      [2K:2K+D)        x_mean
      [2K+D:2K+2D)     element-wise nll
      [2K+2D]          per-example nll sum over D
      rest             zeros
    """
    tb = x_ref.shape[0]
    x = x_ref[...].astype(jnp.float32)                           # (tb, D)

    # ---- encoder: logits = x @ W^T + b, clamped to [-25, 9] (MXU) ----------
    logits = jnp.dot(x, wt_ref[...], preferred_element_type=jnp.float32)
    logits = jnp.clip(logits + b_ref[...], -25.0, 9.0)           # (tb, K)
    probs = jax.nn.sigmoid(logits)                               # q_z probs

    # ---- STRelaxedBernoulli(temperature).rsample() --------------------------
    # Logistic(0,1) noise arrives precomputed from jax.random (wrapper).
    # soft sigmoid relaxation, hard threshold as the forward value.
    # TODO(synk): forward-only; the straight-through VJP (soft gradient) is not
    # implemented here — wrap in jax.custom_vjp if used for training.
    soft = jax.nn.sigmoid((logits + noise_ref[...]) / temperature)
    z = (soft > 0.5).astype(jnp.float32)                         # (tb, K)

    # ---- decode: x_mean = z @ A on the idle MXU ------------------------------
    x_mean = jnp.dot(z, a_ref[...], preferred_element_type=jnp.float32)

    # ---- nll = -Normal(loc=x_mean, scale=sigma_n).log_prob(x) ---------------
    inv_sigma = 1.0 / sigma_n
    log_const = math.log(sigma_n) + 0.5 * math.log(2.0 * math.pi)
    diff = (x - x_mean) * inv_sigma
    nll = 0.5 * diff * diff + log_const                          # (tb, D)
    nll_sum = jnp.sum(nll, axis=-1, keepdims=True)               # (tb, 1)

    # ---- single full-width lane-dense store ----------------------------------
    used = 2 * K + 2 * D + 1
    pad = jnp.zeros((tb, SLAB - used), jnp.float32)
    out_ref[...] = jnp.concatenate([probs, z, x_mean, nll, nll_sum, pad],
                                   axis=-1)


def mf_ibp_vae_pallas_core(x, noise, w_enc_t, b_enc, a_mean,
                           *, sigma_n=0.5, temperature=0.1, tile_b=2048):
    """Runs the fused forward. Returns (nll, nll_sum, q_z_probs, z, x_mean)."""
    B, D = x.shape
    K = a_mean.shape[0]
    assert 2 * K + 2 * D + 1 <= SLAB, "packed slab does not fit in 128 lanes"

    # batch tile: multiple of 8 sublanes, no larger than the (rounded) batch
    tb = max(8, min(int(tile_b), _round_up(B, 8)))
    tb = (tb // 8) * 8
    # keep >= 2 grid steps when possible so the "parallel" batch axis can
    # load-balance the two TensorCores on v7x (no-op on v5e/v6e).
    if pl.cdiv(B, tb) < 2 and B > 8:
        tb = max(8, _round_up(pl.cdiv(B, 2), 8))
    grid = (pl.cdiv(B, tb),)   # trailing partial block is masked by Pallas

    kernel = functools.partial(_mf_ibp_vae_kernel, K=K, D=D,
                               sigma_n=float(sigma_n),
                               temperature=float(temperature))

    slab = pl.pallas_call(
        kernel,
        out_shape=jax.ShapeDtypeStruct((B, SLAB), jnp.float32),
        grid=grid,
        in_specs=[
            pl.BlockSpec((tb, D), lambda i: (i, 0)),   # x tile (orig dtype)
            pl.BlockSpec((tb, K), lambda i: (i, 0)),   # logistic noise tile
            pl.BlockSpec((D, K), lambda i: (0, 0)),    # W^T, VMEM-resident
            pl.BlockSpec((1, K), lambda i: (0, 0)),    # bias, VMEM-resident
            pl.BlockSpec((K, D), lambda i: (0, 0)),    # A,   VMEM-resident
        ],
        out_specs=pl.BlockSpec((tb, SLAB), lambda i: (i, 0)),
        compiler_params=pltpu.CompilerParams(
            dimension_semantics=("parallel",)),
    )(x,
      noise.astype(jnp.float32),
      w_enc_t.astype(jnp.float32),
      b_enc.reshape(1, K).astype(jnp.float32),
      a_mean.astype(jnp.float32))

    # NOTE: downstream code that can consume the packed slab directly avoids
    # this extra HBM re-read/re-write; we slice here to match the torch API.
    probs = slab[:, 0:K]
    z = slab[:, K:2 * K]
    x_mean = slab[:, 2 * K:2 * K + D]
    nll = slab[:, 2 * K + D:2 * K + 2 * D]
    nll_sum = slab[:, 2 * K + 2 * D]
    return nll, nll_sum, probs, z, x_mean


def init_params(key, D=36, K=6, alpha0=5.0):
    """Deterministic re-implementation of MF_IBP_VAE.__init__ (init=None)."""
    a_val = math.log(math.exp(alpha0) - 1.0)
    b_val = math.log(math.exp(1.0) - 1.0)
    w = 0.01 * jax.random.normal(key, (K, D), dtype=jnp.float32)
    return {
        "w_enc": w,                                       # encoder.weight (K, D)
        "w_enc_t": jnp.transpose(w),                      # cached (D, K) for MXU
        "b_enc": jnp.zeros((K,), jnp.float32),            # encoder.bias
        "A_mean": jnp.zeros((K, D), jnp.float32),
        "A_logvar": jnp.zeros((K, D), jnp.float32),
        "beta_a": jnp.full((K,), a_val, jnp.float32),
        "beta_b": jnp.full((K,), b_val, jnp.float32),
    }


def mf_ibp_vae_forward(params, x, key, *, alpha0=5.0, sigma_n=0.5,
                       temperature=0.1, tile_b=2048):
    """Returns nll plus the parameters of every distribution in the torch forward."""
    B, D = x.shape
    K = params["beta_a"].shape[0]
    k_nu, k_noise = jax.random.split(key)

    # q_nu = Beta(softplus(a)+0.01, softplus(b)+0.01); nu = q_nu.rsample()
    beta_a = jax.nn.softplus(params["beta_a"]) + 0.01
    beta_b = jax.nn.softplus(params["beta_b"]) + 0.01
    nu = jax.random.beta(k_nu, beta_a, beta_b)

    # p_z = Bernoulli(exp(cumsum(log(nu + SMALL)))) broadcast over the batch
    logpi = jnp.cumsum(jnp.log(nu + SMALL), axis=-1)
    p_z_probs = jnp.broadcast_to(jnp.exp(logpi)[None, :], (B, K))

    # Logistic(0,1) noise for the relaxed-Bernoulli rsample (tiny (B, K) stream)
    noise = jax.random.logistic(k_noise, (B, K), dtype=jnp.float32)

    nll, nll_sum, q_z_probs, z, x_mean = mf_ibp_vae_pallas_core(
        x, noise, params["w_enc_t"], params["b_enc"], params["A_mean"],
        sigma_n=sigma_n, temperature=temperature, tile_b=tile_b)

    return {
        "nll": nll,                                               # (B, D)
        "nll_sum": nll_sum,                                       # (B,)
        "z": z,                                                   # (B, K)
        "x_mean": x_mean,                                         # (B, D)
        "p_nu": (jnp.full((K,), alpha0, jnp.float32),
                 jnp.ones((K,), jnp.float32)),                    # Beta(alpha0, 1)
        "q_nu": (beta_a, beta_b),                                 # Beta(a, b)
        "p_z_probs": p_z_probs,                                   # Bernoulli probs
        "q_z_probs": q_z_probs,                                   # Bernoulli probs
        "p_a": (jnp.zeros((), jnp.float32), jnp.ones((), jnp.float32)),
        "q_a": (params["A_mean"], jnp.exp(params["A_logvar"] / 2.0)),
    }


if __name__ == "__main__":
    key = jax.random.PRNGKey(0)
    k_params, k_a, k_x, k_fwd = jax.random.split(key, 4)

    D, K, B = 36, 6, 16          # module defaults D=36, truncation K=6
    sigma_n = 0.5

    params = init_params(k_params, D=D, K=K)
    # non-trivial dictionary so the decode / nll path is actually exercised
    params["A_mean"] = 0.1 * jax.random.normal(k_a, (K, D), dtype=jnp.float32)
    x = jax.random.normal(k_x, (B, D), dtype=jnp.float32)

    # tile_b=8 -> grid of 2 batch tiles, exercising the pipelined grid path
    out = mf_ibp_vae_forward(params, x, k_fwd, sigma_n=sigma_n, tile_b=8)
    out = jax.block_until_ready(out)

    # ---- consistency checks against a pure-JAX recomputation (same z) ------
    hi = jax.lax.Precision.HIGHEST
    logits_ref = jnp.clip(
        jnp.dot(x, params["w_enc_t"], precision=hi) + params["b_enc"][None, :],
        -25.0, 9.0)
    probs_ref = jax.nn.sigmoid(logits_ref)
    z = out["z"]
    x_mean_ref = jnp.dot(z, params["A_mean"], precision=hi)
    nll_ref = (0.5 * ((x - x_mean_ref) / sigma_n) ** 2
               + math.log(sigma_n) + 0.5 * math.log(2.0 * math.pi))

    assert out["nll"].shape == (B, D)
    assert out["nll_sum"].shape == (B,)
    assert out["q_z_probs"].shape == (B, K)
    assert z.shape == (B, K)
    assert out["x_mean"].shape == (B, D)
    assert bool(jnp.all((z == 0.0) | (z == 1.0)))
    assert bool(jnp.allclose(out["q_z_probs"], probs_ref, atol=1e-3))
    assert bool(jnp.allclose(out["x_mean"], x_mean_ref, atol=1e-3))
    assert bool(jnp.allclose(out["nll"], nll_ref, atol=1e-3))
    assert bool(jnp.allclose(out["nll_sum"], nll_ref.sum(axis=1), atol=1e-2))
    assert bool(jnp.all(jnp.isfinite(out["nll"])))

    print("KERNEL_OK")
</pallas_src>

<mosaic_0001>
module attributes {stable_mosaic.version = 11 : i64} {
  func.func @_mf_ibp_vae_kernel(%arg0: i32, %arg1: memref<8x36xf32, #tpu.memory_space<vmem>>, %arg2: memref<8x6xf32, #tpu.memory_space<vmem>>, %arg3: memref<36x6xf32, #tpu.memory_space<vmem>>, %arg4: memref<1x6xf32, #tpu.memory_space<vmem>>, %arg5: memref<6x36xf32, #tpu.memory_space<vmem>>, %arg6: memref<8x128xf32, #tpu.memory_space<vmem>>) attributes {dimension_semantics = [#tpu.dimension_semantics<parallel>], iteration_bounds = array<i64: 2>, scalar_prefetch = 0 : i64, scratch_operands = 0 : i64, tpu.core_type = #tpu.core_type<tc>, window_params = [{transform_indices = @transform_0, window_bounds = array<i64: 8, 36>}, {transform_indices = @transform_1, window_bounds = array<i64: 8, 6>}, {pipeline_mode = #tpu.pipeline_mode<synchronous>, transform_indices = @transform_2, window_bounds = array<i64: 36, 6>}, {pipeline_mode = #tpu.pipeline_mode<synchronous>, transform_indices = @transform_3, window_bounds = array<i64: 1, 6>}, {pipeline_mode = #tpu.pipeline_mode<synchronous>, transform_indices = @transform_4, window_bounds = array<i64: 6, 36>}, {transform_indices = @transform_5, window_bounds = array<i64: 8, 128>}]} {
    %c0 = arith.constant 0 : index
    %c0_0 = arith.constant 0 : index
    %0 = vector.load %arg1[%c0, %c0_0] : memref<8x36xf32, #tpu.memory_space<vmem>>, vector<8x36xf32>
    %c0_1 = arith.constant 0 : index
    %c0_2 = arith.constant 0 : index
    %1 = vector.load %arg3[%c0_1, %c0_2] : memref<36x6xf32, #tpu.memory_space<vmem>>, vector<36x6xf32>
    %cst = arith.constant dense<0.000000e+00> : vector<8x6xf32>
    %2 = tpu.matmul %0, %1, %cst {dimension_numbers = #tpu.dot_dimension_numbers<[1], [0], [0], [1], [0, 0, 1, 1], [], []>} : vector<8x36xf32>, vector<36x6xf32>, vector<8x6xf32> -> vector<8x6xf32>
    %c0_3 = arith.constant 0 : index
    %c0_4 = arith.constant 0 : index
    %3 = vector.load %arg4[%c0_3, %c0_4] : memref<1x6xf32, #tpu.memory_space<vmem>>, vector<1x6xf32>
    %4 = vector.broadcast %3 : vector<1x6xf32> to vector<8x6xf32>
    %5 = arith.addf %2, %4 : vector<8x6xf32>
    %cst_5 = arith.constant -2.500000e+01 : f32
    %cst_6 = arith.constant 9.000000e+00 : f32
    %6 = vector.broadcast %cst_5 : f32 to vector<8x6xf32>
    %7 = arith.maximumf %6, %5 : vector<8x6xf32>
    %8 = vector.broadcast %cst_6 : f32 to vector<8x6xf32>
    %9 = arith.minimumf %8, %7 : vector<8x6xf32>
    %10 = arith.negf %9 : vector<8x6xf32>
    %11 = math.exp %10 : vector<8x6xf32>
    %cst_7 = arith.constant 1.000000e+00 : f32
    %12 = vector.broadcast %cst_7 : f32 to vector<8x6xf32>
    %13 = arith.addf %12, %11 : vector<8x6xf32>
    %14 = arith.divf %12, %13 : vector<8x6xf32>
    %c0_8 = arith.constant 0 : index
    %c0_9 = arith.constant 0 : index
    %15 = vector.load %arg2[%c0_8, %c0_9] : memref<8x6xf32, #tpu.memory_space<vmem>>, vector<8x6xf32>
    %16 = arith.addf %9, %15 : vector<8x6xf32>
    %cst_10 = arith.constant 1.000000e-01 : f32
    %17 = vector.broadcast %cst_10 : f32 to vector<8x6xf32>
    %18 = arith.divf %16, %17 : vector<8x6xf32>
    %19 = arith.negf %18 : vector<8x6xf32>
    %20 = math.exp %19 : vector<8x6xf32>
    %cst_11 = arith.constant 1.000000e+00 : f32
    %21 = vector.broadcast %cst_11 : f32 to vector<8x6xf32>
    %22 = arith.addf %21, %20 : vector<8x6xf32>
    %23 = arith.divf %21, %22 : vector<8x6xf32>
    %cst_12 = arith.constant 5.000000e-01 : f32
    %24 = vector.broadcast %cst_12 : f32 to vector<8x6xf32>
    %25 = arith.cmpf ogt, %23, %24 : vector<8x6xf32>
    %26 = arith.extui %25 : vector<8x6xi1> to vector<8x6xi32>
    %27 = arith.sitofp %26 : vector<8x6xi32> to vector<8x6xf32>
    %c0_13 = arith.constant 0 : index
    %c0_14 = arith.constant 0 : index
    %28 = vector.load %arg5[%c0_13, %c0_14] : memref<6x36xf32, #tpu.memory_space<vmem>>, vector<6x36xf32>
    %cst_15 = arith.constant dense<0.000000e+00> : vector<8x36xf32>
    %29 = tpu.matmul %27, %28, %cst_15 {dimension_numbers = #tpu.dot_dimension_numbers<[1], [0], [0], [1], [0, 0, 1, 1], [], []>} : vector<8x6xf32>, vector<6x36xf32>, vector<8x36xf32> -> vector<8x36xf32>
    %30 = arith.subf %0, %29 : vector<8x36xf32>
    %cst_16 = arith.constant 2.000000e+00 : f32
    %31 = vector.broadcast %cst_16 : f32 to vector<8x36xf32>
    %32 = arith.mulf %30, %31 : vector<8x36xf32>
    %cst_17 = arith.constant 5.000000e-01 : f32
    %33 = vector.broadcast %cst_17 : f32 to vector<8x36xf32>
    %34 = arith.mulf %33, %32 : vector<8x36xf32>
    %35 = arith.mulf %34, %32 : vector<8x36xf32>
    %cst_18 = arith.constant 0.22579135 : f32
    %36 = vector.broadcast %cst_18 : f32 to vector<8x36xf32>
    %37 = arith.addf %35, %36 : vector<8x36xf32>
    %cst_19 = arith.constant dense<0.000000e+00> : vector<8xf32>
    %38 = vector.multi_reduction <add>, %37, %cst_19 [1] : vector<8x36xf32> to vector<8xf32>
    %39 = vector.shape_cast %38 : vector<8xf32> to vector<8x1xf32>
    %cst_20 = arith.constant 0.000000e+00 : f32
    %40 = vector.broadcast %cst_20 : f32 to vector<8x43xf32>
    %41 = tpu.concatenate %14, %27, %29, %37, %39, %40 in 1 : vector<8x6xf32>, vector<8x6xf32>, vector<8x36xf32>, vector<8x36xf32>, vector<8x1xf32>, vector<8x43xf32> -> vector<8x128xf32>
    %c0_21 = arith.constant 0 : index
    %c0_22 = arith.constant 0 : index
    %42 = vector.load %arg6[%c0_21, %c0_22] : memref<8x128xf32, #tpu.memory_space<vmem>>, vector<8x128xf32>
    tpu.vector_store %arg6[%c0_21, %c0_22], %41 {strides = array<i32>} : memref<8x128xf32, #tpu.memory_space<vmem>>, vector<8x128xf32>,
    return
  }
  func.func @transform_0(%arg0: i32) -> (i32, i32) {
    %c0_i32 = arith.constant 0 : i32
    %c0_i32_0 = arith.constant 0 : i32
    return %arg0, %c0_i32 : i32, i32
  }
  func.func @transform_1(%arg0: i32) -> (i32, i32) {
    %c0_i32 = arith.constant 0 : i32
    %c0_i32_0 = arith.constant 0 : i32
    return %arg0, %c0_i32 : i32, i32
  }
  func.func @transform_2(%arg0: i32) -> (i32, i32) {
    %c0_i32 = arith.constant 0 : i32
    %c0_i32_0 = arith.constant 0 : i32
    %c0_i32_1 = arith.constant 0 : i32
    return %c0_i32, %c0_i32_0 : i32, i32
  }
  func.func @transform_3(%arg0: i32) -> (i32, i32) {
    %c0_i32 = arith.constant 0 : i32
    %c0_i32_0 = arith.constant 0 : i32
    %c0_i32_1 = arith.constant 0 : i32
    return %c0_i32, %c0_i32_0 : i32, i32
  }
  func.func @transform_4(%arg0: i32) -> (i32, i32) {
    %c0_i32 = arith.constant 0 : i32
    %c0_i32_0 = arith.constant 0 : i32
    %c0_i32_1 = arith.constant 0 : i32
    return %c0_i32, %c0_i32_0 : i32, i32
  }
  func.func @transform_5(%arg0: i32) -> (i32, i32) {
    %c0_i32 = arith.constant 0 : i32
    %c0_i32_0 = arith.constant 0 : i32
    return %arg0, %c0_i32 : i32, i32
  }
}

</mosaic_0001>

<bundles_post_ra>
// kernel: tpu_custom_call.1
= control target key start
LH: loop header
LB: loop body
LE: loop exit
PB: predicated region body
PF: predicated region fallthrough
CT: control target
= control target key end

     0   :  { %10 = vsyncpa [#allocation3], 0  ;;  %s762_s0 = inlined_call_operand.vmem [shape: f32[16,36], index: 0, kind: input, shape index: {}]   ;;  %s763_s1 = inlined_call_operand.vmem [shape: f32[16,6], index: 1, kind: input, shape index: {}]   ;;  %s764_s2 = inlined_call_operand.vmem [shape: f32[36,6], index: 2, kind: input, shape index: {}]   ;;  %s765_s3 = inlined_call_operand.vmem [shape: f32[1,6], index: 3, kind: input, shape index: {}]   ;;  %s766_s4 = inlined_call_operand.vmem [shape: f32[6,36], index: 4, kind: input, shape index: {}]   ;;  %s767_s5 = inlined_call_operand.hbm [shape: f32[16,128], index: 5, kind: output, shape index: {}]  }
   0x1   :  { %12 = vsyncpa [#allocation3 + $0x1], 0  ;;  %s645_s18 = smov 0   ;;  %s647_s19 = smov 0  }
   0x2   :  { %s649_s20 = smov 0   ;;  %s651_s21 = smov 0  }
   0x3 LB: > { %s666_s22 = sadd.s32 4294967295, %s608_s21   ;;  %s473_s23 = sadd.s32 4294967294, %s608_s21   ;;  %s608_s21 = sphi %s651_s21, %s773_s21   ;;  %s604_s20 = sphi %s649_s20, %s772_s20   ;;  %s600_s19 = sphi %s647_s19, %s771_s19   ;;  %s596_s18 = sphi %s645_s18, %s770_s18  }
   0x4   : > { %s670_s24 = sadd.s32 1, %s608_s21   ;;  %s140_s25 = sadd.s32 1, %s604_s20 }
   0x5   : > { %s137_s26 = ssub.s32 %s608_s21, %s670_s24  ;;  %p150_p0 = scmp.ne.s32.totalorder %s604_s20, %s600_s19 }
   0x6   : > { %p138_p1 = scmp.eq.s32.totalorder %s137_s26, 0  ;;  %p151_p2 = scmp.eq.s32.totalorder %s666_s22, 1 }
   0x7   : > { %p156_p3 = scmp.ne.s32.totalorder %s600_s19, %s596_s18  ;;  %p157_p4 = scmp.eq.s32.totalorder %s473_s23, 1 }
   0x8   : > { %s681_s27 = scalar_select %p138_p1, %s604_s20, %s140_s25  }
   0x9   : > { %p683_p5 = por %p151_p2, %p150_p0  ;;  %p687_p6 = por %p157_p4, %p156_p3 }
   0xa   : > { %p476_p7 = scmp.ge.s32.totalorder %s608_s21, 1  ;;  %p198_p8 = scmp.lt.s32.totalorder %s608_s21, 3 }
   0xc   : > { %p199_p9 = pnand %p476_p7, %p198_p8 }
   0xd   : > { %p229_p10 = scmp.lt.s32.totalorder (!%p199_p9), %s666_s22, 1  ;;  %s613_s12 = smov (!%p199_p9), 12  }
   0xe   : > { %202 = sbr.rel (%p199_p9) target bundleno = 478 (0x1de), region = 40  ;;  %s614_s13 = smov (!%p199_p9), 48  }
   0xf   : > { %s488_s16 = sshll.u32 (!%p199_p9), %s666_s22, 3 }
  0x10   : > { %s397_s25 = scalar_lea.hbm (!%p199_p9), %s767_s5, %s488_s16 }
  0x13   : > { %v242_v0 = vld [vmem:[%s764_s2 + $0x20] sm:$0xf]  ;;  %vm251_vm0 = vcmask 1043456   ;;  %v241_v1 = vld [vmem:[%s764_s2 + $0x18] sm:$0xff]  ;;  %v240_v2 = vld [vmem:[%s764_s2 + $0x10] sm:$0xff]  ;;  %s230_s11 = scalar_select %p229_p10, %s666_s22, 1 }
  0x14   : > { %480 = vmatpush.msk.msra.mxu0 %vm251_vm0, %v242_v0  ;;  %v239_v3 = vld [vmem:[%s764_s2 + $0x8] sm:$0xff]  ;;  %v238_v4 = vld [vmem:[%s764_s2] sm:$0xff]  ;;  %vm247_vm1 = vcmask 293888   ;;  %v610_v6 = vmov 0.1   ;;  %vm333_vm2 = vcmask 1045504  }
  0x15   : > { %s478_s14 = sshll.u32 %s230_s11, 3  ;;  %536 = vrcp.f32 %v610_v6  ;;  %v328_v9 = vld [vmem:[%s766_s4] sm:$0x3f]  ;;  %vm329_vm8 = vcmask 48128   ;;  %v611_v35 = vmov 0.0   ;;  %s612_s11 = smov 6  }
  0x16   : > { %267 = vmatpush.msra.mxu0 %v241_v1  ;;  %s232_s17 = scalar_lea.vmem %s762_s0, %s478_s14  ;;  %485 = vmatpush.msk.msra.mxu1 %vm333_vm2, %v328_v9  ;;  %v535_v11 = vld [vmem:[%s765_s3] ss:$0 sm:$0xff]  ;;  %s236_s10 = scalar_lea.vmem %s763_s1, %s478_s14  ;;  %vm377_vm14 = vcmask 97280   ;;  %vm379_vm15 = vcmask 392192   ;;  %vm381_vm0 = vcmask 687104  }
  0x17   : > { %v237_v5 = vld [vmem:[%s232_s17] sm:$0xff]  ;;  %s226_s14 = sand.u32 1, %s600_s19   ;;  %s401_s22 = sshll.u32 %s397_s25, 4  ;;  %s402_s22 = int_to_ptr.hbm [resolvable:$true] %s401_s22 }
  0x18   : > { %268 = vmatpush.msra.mxu0 %v240_v2  ;;  %v296_v17 = vld [vmem:[%s236_s10] sm:$0xff]  ;;  %s477_s15 = sshll.u32 %s226_s14, 3  ;;  %s387_s6 = scalar_lea.sflag [#allocation3], %s226_s14 }
  0x19   : > { %s228_s26 = scalar_lea.vmem [#allocation2], %s477_s15  ;;  %s560_s7 = sshra.s32 %s402_s22, 4  ;;  %s561_s7 = int_to_ptr.hbm [resolvable:$true] %s560_s7 }
  0x1a   : > { %269 = vmatpush.msra.mxu0 %v239_v3  ;;  %s399_s30 = sshll.u32 %s228_s26, 4  ;;  %s562_s8 = scalar_lea.hbm %s561_s7, 8  ;;  %s400_s30 = int_to_ptr.vmem [resolvable:$true] %s399_s30 }
  0x1b   : > { %v537_v7 = vpop.eup %536  ;;  %p563_p11 = scmp.ne.s32.totalorder %s561_s7, %s562_s8  ;;  %p567_p0 = scmp.lt.s32.totalorder %s561_s7, %s767_s5 }
  0x1c   : > { %270 = vmatpush.msra.mxu0 %v238_v4  ;;  %v299_v8 = vmul.f32 0.1, %v537_v7  ;;  %vm303_vm3 = vweird.f32 %v537_v7 }
  0x1d   : > { %481 = vmatmul.msk.f32.vlgmr.msra.gmra.mxu0 %vm247_vm1, %v237_v5  ;;  %p564_p12 = pnand %p563_p11, %p683_p5 }
  0x1e   : > { %v300_v10 = vsub.f32 1.0, %v299_v8 }
  0x1f   : > { %p565_p13 = pneg %p564_p12 }
  0x20   : > { %v301_v12 = vmul.f32 %v537_v7, %v300_v10 }
  0x22   : > { %v302_v15 = vadd.f32 %v537_v7, %v301_v12 }
  0x24   : > { %v304_v19 = vsel %vm303_vm3, %v537_v7, %v302_v15 }
  0x9a   : > { %v272_v13 = vpop.f32.mrf.mxu0 }
  0x9b   : > { %v273_v14 = vadd.f32 %v535_v11, %v272_v13 }
  0x9d   : > { %v275_v16 = vmax.f32 %v273_v14, -25.0 }
  0x9f   : > { %v276_v18 = vmin.f32 %v275_v16, 9.0 }
  0xa1   : > { %v297_v20 = vadd.f32 %v296_v17, %v276_v18  ;;  %v482_v44 = vmul.f32 -1.442695, %v276_v18 }
  0xa3   : > { %v305_v21 = vmul.f32 %v304_v19, %v297_v20 }
  0xa5   : > { %v483_v22 = vmul.f32 -1.442695, %v305_v21 }
  0xa7   : > { %538 = vpow2.f32 %v483_v22 }
  0xad   : > { %v539_v23 = vpop.eup %538 }
  0xae   : > { %v309_v24 = vadd.f32 1.0, %v539_v23 }
  0xb0   : > { %540 = vrcp.f32 %v309_v24  ;;  %v321_v28 = vand.u32 2147483648, %v309_v24  ;;  %v319_v30 = vand.u32 2147483647, %v309_v24  ;;  %vm315_vm5 = vweird.f32 %v309_v24 }
  0xb1   : > { %542 = vpow2.f32 %v482_v44 }
  0xb2   : > { %v322_v32 = vor.u32 1.1754944e-38, %v321_v28  ;;  %vm320_vm7 = vcmp.eq.f32.partialorder %v319_v30, 8.507059e+37 }
  0xb6   : > { %v541_v25 = vpop.eup %540 }
  0xb7   : > { %v311_v26 = vmul.f32 %v541_v25, %v309_v24  ;;  %vm316_vm4 = vweird.f32 %v541_v25  ;;  %v543_v45 = vpop.eup %542 }
  0xb8   : > { %vm317_vm6 = vmor %vm315_vm5, %vm316_vm4  ;;  %v280_v46 = vadd.f32 1.0, %v543_v45 }
  0xb9   : > { %v312_v27 = vsub.f32 1.0, %v311_v26 }
  0xba   : > { %544 = vrcp.f32 %v280_v46  ;;  %v292_v53 = vand.u32 2147483648, %v280_v46  ;;  %vm286_vm11 = vweird.f32 %v280_v46  ;;  %v290_v55 = vand.u32 2147483647, %v280_v46 }
  0xbb   : > { %v313_v29 = vmul.f32 %v541_v25, %v312_v27 }
  0xbc   : > { %v293_v57 = vor.u32 1.1754944e-38, %v292_v53  ;;  %vm291_vm13 = vcmp.eq.f32.partialorder %v290_v55, 8.507059e+37 }
  0xbd   : > { %v314_v31 = vadd.f32 %v541_v25, %v313_v29 }
  0xbf   : > { %v318_v33 = vsel %vm317_vm6, %v541_v25, %v314_v31 }
  0xc0   : > { %v323_v34 = vsel %vm320_vm7, %v322_v32, %v318_v33  ;;  %v545_v47 = vpop.eup %544 }
  0xc1   : > { %vm325_vm9 = vcmp.gt.f32.partialorder %v323_v34, 0.5  ;;  %v282_v48 = vmul.f32 %v545_v47, %v280_v46  ;;  %vm287_vm10 = vweird.f32 %v545_v47 }
  0xc2   : > { %v484_v36 = vsel %vm325_vm9, 1.0, %v611_v35  ;;  %vm288_vm12 = vmor %vm286_vm11, %vm287_vm10 }
  0xc3   : > { %365 = vrot.lane.b32.xlu0 %v484_v36, %s612_s11  ;;  %486 = vmatmul.msk.f32.vlgmr.msra.gmra.mxu1 %vm329_vm8, %v484_v36  ;;  %v283_v49 = vsub.f32 1.0, %v282_v48  ;;  %s566_s11 = scalar_lea.hbm %s767_s5, 16 }
  0xc4   : > { %p568_p1 = scmp.lt.s32.totalorder %s566_s11, %s562_s8 }
  0xc5   : > { %v284_v50 = vmul.f32 %v545_v47, %v283_v49 }
  0xc6   : > { %p569_p2 = por %p568_p1, %p567_p0 }
  0xc7   : > { %v285_v52 = vadd.f32 %v545_v47, %v284_v50 }
  0xc8   : > { %p570_p3 = pnand %p569_p2, %p565_p13 }
  0xc9   : > { %v289_v56 = vsel %vm288_vm12, %v545_v47, %v285_v52 }
  0xca   : > { %v294_v59 = vsel %vm291_vm13, %v293_v57, %v289_v56 }
 0x135   : > { %v366_v51 = vpop.permute.xlu0 %365 }
 0x136   : > { %v376_v60 = vsel %vm329_vm8, %v294_v59, %v366_v51 }
 0x140   : > { %v354_v37 = vpop.f32.mrf.mxu1 }
 0x141   : > { %v357_v38 = vsub.f32 %v237_v5, %v354_v37  ;;  %369 = vrot.lane.b32.xlu0 %v354_v37, %s613_s12 }
 0x143   : > { %v358_v39 = vmul.f32 2.0, %v357_v38 }
 0x145   : > { %v359_v40 = vmul.f32 0.5, %v358_v39 }
 0x147   : > { %v360_v41 = vmul.f32 %v359_v40, %v358_v39 }
 0x149   : > { %v361_v42 = vadd.f32 0.22579135, %v360_v41 }
 0x14b   : > { %v362_v43 = vsel %vm247_vm1, %v361_v42, 0.0  ;;  %vm383_vm1 = vcmask 695296  }
 0x14c   : > { %363 = vadd.xlane.f32.xlu1 %v362_v43 }
 0x165   : > { %373 = vrot.lane.b32.xlu1 %v361_v42, %s614_s13 }
 0x1b3   : > { %v370_v58 = vpop.permute.xlu0 %369 }
 0x1b4   : > { %v378_v61 = vsel %vm377_vm14, %v376_v60, %v370_v58 }
 0x1bf   : > { %v364_v54 = vpop.xlane.xlu1 %363 }
 0x1d7   : > { %v374_v62 = vpop.permute.xlu1 %373 }
 0x1d8   : > { %v380_v63 = vsel %vm379_vm15, %v378_v61, %v374_v62 }
 0x1d9   : > { %v382_v0 = vsel %vm381_vm0, %v380_v63, %v364_v54 }
 0x1da   : > { %v384_v1 = vsel %vm383_vm1, %v382_v0, 0.0 }
 0x1db   : > { %385 = vst [vmem:[%s228_s26] sm:$0xff] %v384_v1 }
 0x1dc   : > { %573 = shalt.err (!%p570_p3)
}
 0x1dd   : > { %491 = dma.vmem_to_hbm [thread:$0]  (%p683_p5), %s400_s30, 128, %s402_s22, %s387_s6  }
 0x1de PF: > { %p497_p4 = scmp.ge.s32.totalorder %s608_s21, 2  ;;  %s413_s14 = sand.u32 1, %s596_s18  }
 0x1df   : > { %s414_s15 = scalar_lea.sflag [#allocation3], %s413_s14 }
 0x1e0   : > { %p494_p7 = pnand %p497_p4, %p687_p6 }
 0x1e2   : > { %p495_p8 = pneg %p494_p7 }
 0x1e4   : > { %591 = dma.done.wait (%p495_p8), %s414_s15, 128  }
 0x1e5   : > { %593 = vsyncadd (%p495_p8), %s414_s15, 4294967168  ;;  %p15_p9 = scmp.ge.s32.totalorder %s670_s24, 4   ;;  %s770_s18 = smov %s600_s19 }
 0x1e6   : > { %s771_s19 = smov %s604_s20  ;;  %s772_s20 = smov %s681_s27 }
 0x1e7   : > { %s773_s21 = smov %s670_s24  ;;  %17 = sbr.rel (!%p15_p9) target bundleno = 3 (0x3), region = 78 }
 0x1ec   :  { %420 = vsyncpa [#allocation3], 1 }
 0x1ed   :  { %422 = vsyncpa [#allocation3 + $0x1], 1 }

</bundles_post_ra>
